<compile_context>
chip_gen: v7x
topology: tpu7x:2x2x1
jax: 0.10.0
libtpu: 0.0.40
codegen_flags: <defaults>
</compile_context>

<pallas_src>
import jax
import jax.numpy as jnp
from jax.experimental import pallas as pl
from jax.experimental.pallas import tpu as pltpu

_LANES = 128
_SUBLANES = 8
_MAX_TILE_ROWS = 4096          # 4096 * 128 * 4 B = 2 MiB per block


def _round_up(x, m):
    return ((x + m - 1) // m) * m


def _fused_affine_kernel(m_ref, b_ref, x_ref, o_ref):
    # m_ref: (128, 128) VMEM block-diagonal folded weight, kron(I_64, W^T).
    # b_ref: (1, 128)   VMEM interleaved folded bias [b0, b1, b0, b1, ...].
    # x_ref/o_ref: (tile_rows, 128) VMEM -- the raw row-major (batch, 2) data
    # reinterpreted lane-dense; even lanes = feature 0, odd lanes = feature 1.
    o_ref[...] = (
        jnp.dot(
            x_ref[...],
            m_ref[...],
            preferred_element_type=jnp.float32,
            precision=jax.lax.Precision.HIGHEST,
        )
        + b_ref[...]
    ).astype(o_ref.dtype)


def b_forward(x, wa, ba, wb, bb, *, tile_rows=None):
    """x: (B, 2) f32; wa, wb: (2, 2); ba, bb: (2,). Returns (B, 2)."""
    # Fold the two Linear layers: z = x @ (wb@wa).T + (wb@ba + bb).  Then fold
    # the even/odd lane interleave of the flat row-major buffer into a 128x128
    # block-diagonal weight + 128-wide bias so the kernel needs no transpose or
    # deinterleave at all.
    w = wb @ wa                                                     # (2, 2)
    bias2 = wb @ ba + bb                                            # (2,)
    m = jnp.kron(jnp.eye(64, dtype=x.dtype), w.T.astype(x.dtype))   # (128, 128)
    bvec = jnp.tile(bias2.astype(x.dtype), 64).reshape(1, _LANES)   # (1, 128)

    batch = x.shape[0]
    n = 2 * batch
    rows = max(_SUBLANES, _round_up(pl.cdiv(n, _LANES), _SUBLANES))

    if tile_rows is None:
        # ~2 MiB blocks, but aim for >= 2 grid steps (v7x has 2 TensorCores).
        tile_rows = max(
            _SUBLANES,
            min(_MAX_TILE_ROWS, _round_up(pl.cdiv(rows, 2), _SUBLANES)),
        )
    tile_rows = min(tile_rows, rows)

    flat = x.reshape(-1)                      # free reshape, no transpose
    pad = rows * _LANES - n
    if pad:
        flat = jnp.pad(flat, (0, pad))        # only up to the next 8x128 slab
    xr = flat.reshape(rows, _LANES)           # free reshape

    grid = pl.cdiv(rows, tile_rows)           # ragged trailing block handled by Pallas

    out = pl.pallas_call(
        _fused_affine_kernel,
        out_shape=jax.ShapeDtypeStruct((rows, _LANES), x.dtype),
        grid=(grid,),
        in_specs=[
            pl.BlockSpec((_LANES, _LANES), lambda i: (0, 0)),   # folded weight (resident)
            pl.BlockSpec((1, _LANES), lambda i: (0, 0)),        # folded bias (resident)
            pl.BlockSpec((tile_rows, _LANES), lambda i: (i, 0)),
        ],
        out_specs=pl.BlockSpec((tile_rows, _LANES), lambda i: (i, 0)),
        compiler_params=pltpu.CompilerParams(
            dimension_semantics=("parallel",),
            vmem_limit_bytes=32 * 1024 * 1024,
        ),
    )(m, bvec, xr)

    out_flat = out.reshape(-1)
    if pad:
        out_flat = out_flat[:n]
    return out_flat.reshape(batch, 2)


def _init_linear(key, in_features, out_features):
    # Deterministic init mimicking torch.nn.Linear default (+-1/sqrt(in)).
    kw, kb = jax.random.split(key)
    bound = 1.0 / (in_features ** 0.5)
    w = jax.random.uniform(kw, (out_features, in_features), jnp.float32, -bound, bound)
    b = jax.random.uniform(kb, (out_features,), jnp.float32, -bound, bound)
    return w, b


if __name__ == "__main__":
    key = jax.random.PRNGKey(0)
    kx, ka, kb_ = jax.random.split(key, 3)

    wa, ba = _init_linear(ka, 2, 2)   # A.l1
    wb, bb = _init_linear(kb_, 2, 2)  # B.l1

    # TODO(synk): torch.utils.checkpoint has no forward-pass effect; nothing to port.
    for batch in (8, 1200):           # tiny case + ragged multi-tile case
        x = jax.random.normal(jax.random.fold_in(kx, batch), (batch, 2), jnp.float32)
        z = b_forward(x, wa, ba, wb, bb)
        jax.block_until_ready(z)

        # Reference check in plain JAX (unfused two-layer formulation).
        ref = (x @ wa.T + ba) @ wb.T + bb
        assert z.shape == (batch, 2)
        assert jnp.allclose(z, ref, atol=1e-4, rtol=1e-4), (
            f"mismatch vs reference for batch={batch}")

    print("KERNEL_OK")
</pallas_src>

<mosaic_0001>
module attributes {stable_mosaic.version = 11 : i64} {
  func.func @_fused_affine_kernel(%arg0: i32, %arg1: memref<128x128xf32, #tpu.memory_space<vmem>>, %arg2: memref<1x128xf32, #tpu.memory_space<vmem>>, %arg3: memref<8x128xf32, #tpu.memory_space<vmem>>, %arg4: memref<8x128xf32, #tpu.memory_space<vmem>>) attributes {dimension_semantics = [#tpu.dimension_semantics<parallel>], iteration_bounds = array<i64: 1>, scalar_prefetch = 0 : i64, scratch_operands = 0 : i64, tpu.core_type = #tpu.core_type<tc>, window_params = [{pipeline_mode = #tpu.pipeline_mode<synchronous>, transform_indices = @transform_0, window_bounds = array<i64: 128, 128>}, {pipeline_mode = #tpu.pipeline_mode<synchronous>, transform_indices = @transform_1, window_bounds = array<i64: 1, 128>}, {transform_indices = @transform_2, window_bounds = array<i64: 8, 128>}, {transform_indices = @transform_3, window_bounds = array<i64: 8, 128>}]} {
    %c0 = arith.constant 0 : index
    %c0_0 = arith.constant 0 : index
    %0 = vector.load %arg3[%c0, %c0_0] : memref<8x128xf32, #tpu.memory_space<vmem>>, vector<8x128xf32>
    %c0_1 = arith.constant 0 : index
    %c0_2 = arith.constant 0 : index
    %1 = vector.load %arg1[%c0_1, %c0_2] : memref<128x128xf32, #tpu.memory_space<vmem>>, vector<128x128xf32>
    %cst = arith.constant dense<0.000000e+00> : vector<8x128xf32>
    %2 = tpu.matmul %0, %1, %cst {dimension_numbers = #tpu.dot_dimension_numbers<[1], [0], [0], [1], [0, 0, 1, 1], [], []>, precision = #tpu.contract_precision<fp32>} : vector<8x128xf32>, vector<128x128xf32>, vector<8x128xf32> -> vector<8x128xf32>
    %c0_3 = arith.constant 0 : index
    %c0_4 = arith.constant 0 : index
    %3 = vector.load %arg2[%c0_3, %c0_4] : memref<1x128xf32, #tpu.memory_space<vmem>>, vector<1x128xf32>
    %4 = vector.broadcast %3 : vector<1x128xf32> to vector<8x128xf32>
    %5 = arith.addf %2, %4 : vector<8x128xf32>
    %c0_5 = arith.constant 0 : index
    %c0_6 = arith.constant 0 : index
    %6 = vector.load %arg4[%c0_5, %c0_6] : memref<8x128xf32, #tpu.memory_space<vmem>>, vector<8x128xf32>
    tpu.vector_store %arg4[%c0_5, %c0_6], %5 {strides = array<i32>} : memref<8x128xf32, #tpu.memory_space<vmem>>, vector<8x128xf32>,
    return
  }
  func.func @transform_0(%arg0: i32) -> (i32, i32) {
    %c0_i32 = arith.constant 0 : i32
    %c0_i32_0 = arith.constant 0 : i32
    %c0_i32_1 = arith.constant 0 : i32
    return %c0_i32, %c0_i32_0 : i32, i32
  }
  func.func @transform_1(%arg0: i32) -> (i32, i32) {
    %c0_i32 = arith.constant 0 : i32
    %c0_i32_0 = arith.constant 0 : i32
    %c0_i32_1 = arith.constant 0 : i32
    return %c0_i32, %c0_i32_0 : i32, i32
  }
  func.func @transform_2(%arg0: i32) -> (i32, i32) {
    %c0_i32 = arith.constant 0 : i32
    %c0_i32_0 = arith.constant 0 : i32
    return %arg0, %c0_i32 : i32, i32
  }
  func.func @transform_3(%arg0: i32) -> (i32, i32) {
    %c0_i32 = arith.constant 0 : i32
    %c0_i32_0 = arith.constant 0 : i32
    return %arg0, %c0_i32 : i32, i32
  }
}

</mosaic_0001>

<bundles_post_ra>
// kernel: tpu_custom_call.1
= control target key start
LH: loop header
LB: loop body
LE: loop exit
PB: predicated region body
PF: predicated region fallthrough
CT: control target
= control target key end

     0   :  { %8 = vsyncpa [#allocation3], 0  ;;  %s1584_s0 = inlined_call_operand.hbm [shape: f32[128,128], index: 0, kind: input, shape index: {}]   ;;  %s1585_s1 = inlined_call_operand.vmem [shape: f32[1,128], index: 1, kind: input, shape index: {}]   ;;  %s1586_s2 = inlined_call_operand.hbm [shape: f32[8,128], index: 2, kind: input, shape index: {}]   ;;  %s1587_s3 = inlined_call_operand.hbm [shape: f32[8,128], index: 3, kind: output, shape index: {}]  }
   0x1   :  { %9 = vsyncpa [#allocation6], 0 }
   0x2   :  { %10 = vsyncpa [#allocation4], 0  ;;  %s1270_s12 = smov [#allocation2]   ;;  %s1198_s16 = scalar_lea.hbm %s1584_s0, 2048 }
   0x3   :  { %s16_s13 = sshll.u32 %s1270_s12, 4  ;;  %p1199_p0 = scmp.ne.s32.totalorder %s1584_s0, %s1198_s16  ;;  %s17_s13 = int_to_ptr.vmem [resolvable:$true] %s16_s13 }
   0x4   :  { %p1202_p1 = scmp.lt.u32.totalorder %s1198_s16, %s1584_s0 }
   0x6   :  { %p1204_p2 = pnand %p1202_p1, %p1199_p0 }
   0x8   :  { %1207 = shalt.err (!%p1204_p2)
}
   0x9   :  { %s1208_s21 = scalar_lea.vmem %s17_s13, 2048  ;;  %p1213_p4 = scmp.lt.s32.totalorder %s17_s13, %s17_s13 }
   0xa   :  { %p1209_p3 = scmp.ne.s32.totalorder %s17_s13, %s1208_s21  ;;  %p1214_p5 = scmp.lt.s32.totalorder %s1208_s21, %s1208_s21 }
   0xc   :  { %p1215_p6 = por %p1214_p5, %p1213_p4 }
   0xe   :  { %p1216_p7 = pnand %p1215_p6, %p1209_p3 }
  0x10   :  { %1219 = shalt.err (!%p1216_p7)
}
  0x11   :  { %s1271_s22 = smov 128   ;;  %s1272_s23 = smov 8  }
  0x12   :  { %22 = dma.hbm_to_vmem [thread:$0]  %s1584_s0, 2048, %s17_s13, [#allocation3], %s1271_s22, %s1271_s22, %s1272_s23  }
  0x13   :  { %s1273_s26 = smov [#allocation5]   ;;  %s1220_s30 = scalar_lea.hbm %s1586_s2, 128 }
  0x14   :  { %s31_s27 = sshll.u32 %s1273_s26, 4  ;;  %p1221_p8 = scmp.ne.s32.totalorder %s1586_s2, %s1220_s30  ;;  %s32_s27 = int_to_ptr.vmem [resolvable:$true] %s31_s27 }
  0x15   :  { %p1224_p9 = scmp.lt.u32.totalorder %s1220_s30, %s1586_s2 }
  0x17   :  { %p1226_p10 = pnand %p1224_p9, %p1221_p8 }
  0x19   :  { %1229 = shalt.err (!%p1226_p10)
}
  0x1a   :  { %s1230_s8 = scalar_lea.vmem %s32_s27, 128  ;;  %p1235_p12 = scmp.lt.s32.totalorder %s32_s27, %s32_s27 }
  0x1b   :  { %p1231_p11 = scmp.ne.s32.totalorder %s32_s27, %s1230_s8  ;;  %p1236_p13 = scmp.lt.s32.totalorder %s1230_s8, %s1230_s8 }
  0x1d   :  { %p1237_p0 = por %p1236_p13, %p1235_p12 }
  0x1f   :  { %p1238_p1 = pnand %p1237_p0, %p1231_p11 }
  0x21   :  { %1241 = shalt.err (!%p1238_p1)
}
  0x22   :  { %34 = dma.hbm_to_vmem [thread:$0]  %s1586_s2, 128, %s32_s27, [#allocation6]  }
  0x23   :  { %1264 = dma.done.wait [#allocation3], 2048  }
  0x24   :  { %1265 = vsyncadd [#allocation3], 4294965248 }
  0x25   :  { %1266 = dma.done.wait [#allocation6], 128  }
  0x26   :  { %1267 = vsyncadd [#allocation6], 4294967168  ;;  %v1274_v0 = vmov 0.0|0.0   ;;  %vm1275_vm0 = vmmov 0   ;;  %v1276_v1 = vmov 0.0   ;;  %v42_v2 = vld [vmem:[#allocation2] sm:$0xff] }
  0x27   :  { %1036 = vmatprep.subr.bf16.mxu1 %v1274_v0  ;;  %1108 = vmatprep.subr.bf16.mxu0 %v1274_v0  ;;  %v43_v3 = vld [vmem:[#allocation2 + $0x8] sm:$0xff]  ;;  %v44_v4 = vld [vmem:[#allocation2 + $0x10] sm:$0xff]  ;;  %v66_v5 = vand.u32 4294901760, %v42_v2  ;;  %v45_v7 = vld [vmem:[#allocation2 + $0x18] sm:$0xff]  ;;  %s1277_s11 = smov [#allocation7]  }
  0x28   :  { %858 = vmatprep.mubr.msk.f32.mxu1 %vm1275_vm0, %v1276_v1  ;;  %963 = vmatprep.mubr.msk.f32.mxu0 %vm1275_vm0, %v1276_v1  ;;  %v69_v6 = vand.u32 4294901760, %v43_v3  ;;  %v72_v8 = vand.u32 4294901760, %v44_v4  ;;  %v75_v9 = vand.u32 4294901760, %v45_v7  ;;  %v46_v10 = vld [vmem:[#allocation2 + $0x20] sm:$0xff]  ;;  %v47_v11 = vld [vmem:[#allocation2 + $0x28] sm:$0xff]  ;;  %v48_v16 = vld [vmem:[#allocation2 + $0x30] sm:$0xff] }
  0x29   :  { %v78_v14 = vand.u32 4294901760, %v46_v10  ;;  %v81_v15 = vand.u32 4294901760, %v47_v11  ;;  %v49_v17 = vld [vmem:[#allocation2 + $0x38] sm:$0xff]  ;;  %v84_v19 = vand.u32 4294901760, %v48_v16  ;;  %v1342_v21 = vld [vmem:[#allocation2 + $0x40] sm:$0xff]  ;;  %v1344_v22 = vld [vmem:[#allocation2 + $0x48] sm:$0xff]  ;;  %v1358_v29 = vsub.f32 %v42_v2, %v66_v5 }
  0x2a   :  { %v1328_v12 = vpack.c.bf16 %v69_v6, %v66_v5  ;;  %v1332_v13 = vpack.c.bf16 %v75_v9, %v72_v8  ;;  %v87_v20 = vand.u32 4294901760, %v49_v17  ;;  %v90_v24 = vand.u32 4294901760, %v1342_v21  ;;  %v41_v26 = vld [vmem:[#allocation5] sm:$0xff]  ;;  %v1354_v27 = vld [vmem:[#allocation2 + $0x50] sm:$0xff]  ;;  %v1356_v28 = vld [vmem:[#allocation2 + $0x58] sm:$0xff]  ;;  %s713_s12 = sshll.u32 %s1277_s11, 4  ;;  %s714_s12 = int_to_ptr.vmem [resolvable:$true] %s713_s12 }
  0x2b   :  { %v1338_v18 = vpack.c.bf16 %v81_v15, %v78_v14  ;;  %v93_v25 = vand.u32 4294901760, %v1344_v22  ;;  %v1360_v30 = vand.u32 4294901760, %v41_v26  ;;  %v1362_v31 = vsub.f32 %v43_v3, %v69_v6  ;;  %v1370_v35 = vld [vmem:[#allocation2 + $0x60] sm:$0xff]  ;;  %v1374_v36 = vld [vmem:[#allocation2 + $0x68] sm:$0xff]  ;;  %v1393_v43 = vld [vmem:[#allocation2 + $0x70] sm:$0xff]  ;;  %s1242_s13 = scalar_lea.vmem %s714_s12, 128  ;;  %p1247_p3 = scmp.lt.s32.totalorder %s714_s12, %s714_s12 }
  0x2c   :  { %1038 = vmatpush3.bf16.msra.mxu1 %v1328_v12  ;;  %1110 = vmatpush3.bf16.msra.mxu0 %v1328_v12  ;;  %v1348_v23 = vpack.c.bf16 %v87_v20, %v84_v19  ;;  %v96_v33 = vand.u32 4294901760, %v1354_v27  ;;  %v99_v34 = vand.u32 4294901760, %v1356_v28  ;;  %v1376_v37 = vsub.f32 %v44_v4, %v72_v8  ;;  %v1395_v44 = vld [vmem:[#allocation2 + $0x78] sm:$0xff]  ;;  %p1243_p2 = scmp.ne.s32.totalorder %s714_s12, %s1242_s13  ;;  %p1248_p4 = scmp.lt.s32.totalorder %s1242_s13, %s1242_s13 }
  0x2d   :  { %1039 = vmatprep.subr.bf16.mxu1 %v1274_v0  ;;  %1111 = vmatprep.subr.bf16.mxu0 %v1274_v0  ;;  %v1366_v32 = vpack.c.bf16 %v93_v25, %v90_v24  ;;  %v1378_v38 = vsub.f32 %v45_v7, %v75_v9  ;;  %v102_v39 = vand.u32 4294901760, %v1370_v35  ;;  %v1382_v40 = vsub.f32 %v41_v26, %v1360_v30 }
  0x2e   :  { %v1390_v41 = vpack.c.bf16 %v99_v34, %v96_v33  ;;  %v105_v42 = vand.u32 4294901760, %v1374_v36  ;;  %v159_v45 = vand.u32 4294901760, %v1358_v29  ;;  %v166_v46 = vand.u32 4294901760, %v1362_v31  ;;  %p1249_p5 = por %p1248_p4, %p1247_p3 }
  0x2f   :  { %v1401_v47 = vsub.f32 %v46_v10, %v78_v14  ;;  %v1403_v48 = vsub.f32 %v47_v11, %v81_v15  ;;  %v108_v49 = vand.u32 4294901760, %v1393_v43  ;;  %v111_v50 = vand.u32 4294901760, %v1395_v44 }
  0x30   :  { %1041 = vmatpush3.bf16.msra.mxu1 %v1332_v13  ;;  %1113 = vmatpush3.bf16.msra.mxu0 %v1332_v13  ;;  %v148_v51 = vand.u32 4294901760, %v1382_v40  ;;  %v173_v52 = vand.u32 4294901760, %v1376_v37  ;;  %v1415_v53 = vpack.c.bf16 %v105_v42, %v102_v39  ;;  %v160_v54 = vsub.f32 %v1358_v29, %v159_v45  ;;  %p1250_p6 = pnand %p1249_p5, %p1243_p2 }
  0x31   :  { %1042 = vmatprep.subr.bf16.mxu1 %v1274_v0  ;;  %1114 = vmatprep.subr.bf16.mxu0 %v1274_v0  ;;  %v167_v55 = vsub.f32 %v1362_v31, %v166_v46  ;;  %v180_v56 = vand.u32 4294901760, %v1378_v38  ;;  %v1422_v57 = vsub.f32 %v48_v16, %v84_v19  ;;  %v1424_v58 = vsub.f32 %v49_v17, %v87_v20 }
  0x32   :  { %v149_v59 = vsub.f32 %v1382_v40, %v148_v51  ;;  %v174_v60 = vsub.f32 %v1376_v37, %v173_v52  ;;  %v187_v61 = vand.u32 4294901760, %v1401_v47  ;;  %v194_v62 = vand.u32 4294901760, %v1403_v48 }
  0x33   :  { %v1436_v63 = vpack.c.bf16 %v111_v50, %v108_v49  ;;  %v161_v2 = vand.u32 4294901760, %v160_v54  ;;  %v168_v3 = vand.u32 4294901760, %v167_v55  ;;  %v181_v4 = vsub.f32 %v1378_v38, %v180_v56 }
  0x34   :  { %1044 = vmatpush3.bf16.msra.mxu1 %v1338_v18  ;;  %1116 = vmatpush3.bf16.msra.mxu0 %v1338_v18  ;;  %v1442_v5 = vsub.f32 %v1342_v21, %v90_v24  ;;  %v1445_v6 = vsub.f32 %v1344_v22, %v93_v25  ;;  %v1133_v7 = vpack.c.bf16 %v166_v46, %v159_v45  ;;  %v150_v8 = vand.u32 4294901760, %v149_v59 }
  0x35   :  { %1045 = vmatprep.subr.bf16.mxu1 %v1274_v0  ;;  %1117 = vmatprep.subr.bf16.mxu0 %v1274_v0  ;;  %v175_v9 = vand.u32 4294901760, %v174_v60  ;;  %v188_v10 = vsub.f32 %v1401_v47, %v187_v61  ;;  %v195_v11 = vsub.f32 %v1403_v48, %v194_v62  ;;  %v1061_v14 = vpack.c.bf16 %v168_v3, %v161_v2 }
  0x36   :  { %v182_v15 = vand.u32 4294901760, %v181_v4  ;;  %v201_v16 = vand.u32 4294901760, %v1422_v57  ;;  %v208_v17 = vand.u32 4294901760, %v1424_v58  ;;  %v1458_v19 = vsub.f32 %v1354_v27, %v96_v33 }
  0x37   :  { %v1463_v20 = vsub.f32 %v1356_v28, %v99_v34  ;;  %v1136_v21 = vpack.c.bf16 %v180_v56, %v173_v52  ;;  %v189_v22 = vand.u32 4294901760, %v188_v10  ;;  %v196_v24 = vand.u32 4294901760, %v195_v11 }
  0x38   :  { %1047 = vmatpush3.bf16.msra.mxu1 %v1348_v23  ;;  %1119 = vmatpush3.bf16.msra.mxu0 %v1348_v23  ;;  %v215_v25 = vand.u32 4294901760, %v1442_v5  ;;  %v1064_v26 = vpack.c.bf16 %v182_v15, %v175_v9  ;;  %v202_v45 = vsub.f32 %v1422_v57, %v201_v16  ;;  %v209_v27 = vsub.f32 %v1424_v58, %v208_v17 }
  0x39   :  { %1048 = vmatprep.subr.bf16.mxu1 %v1274_v0  ;;  %1120 = vmatprep.subr.bf16.mxu0 %v1274_v0  ;;  %v222_v33 = vand.u32 4294901760, %v1445_v6  ;;  %v1474_v28 = vsub.f32 %v1370_v35, %v102_v39  ;;  %v1479_v34 = vsub.f32 %v1374_v36, %v105_v42  ;;  %v1067_v46 = vpack.c.bf16 %v196_v24, %v189_v22 }
  0x3a   :  { %v216_v52 = vsub.f32 %v1442_v5, %v215_v25  ;;  %v229_v54 = vand.u32 4294901760, %v1458_v19  ;;  %v203_v35 = vand.u32 4294901760, %v202_v45  ;;  %v210_v39 = vand.u32 4294901760, %v209_v27 }
  0x3b   :  { %v223_v55 = vsub.f32 %v1445_v6, %v222_v33  ;;  %v236_v36 = vand.u32 4294901760, %v1463_v20  ;;  %v1494_v42 = vsub.f32 %v1393_v43, %v108_v49  ;;  %v1499_v56 = vsub.f32 %v1395_v44, %v111_v50 }
  0x3c   :  { %1050 = vmatpush3.bf16.msra.mxu1 %v1366_v32  ;;  %1122 = vmatpush3.bf16.msra.mxu0 %v1366_v32  ;;  %v1142_v59 = vpack.c.bf16 %v208_v17, %v201_v16  ;;  %v217_v60 = vand.u32 4294901760, %v216_v52  ;;  %v1070_v2 = vpack.c.bf16 %v210_v39, %v203_v35  ;;  %v250_v43 = vand.u32 4294901760, %v1479_v34 }
  0x3d   :  { %1051 = vmatprep.subr.bf16.mxu1 %v1274_v0  ;;  %1123 = vmatprep.subr.bf16.mxu0 %v1274_v0  ;;  %v224_v3 = vand.u32 4294901760, %v223_v55  ;;  %v237_v4 = vsub.f32 %v1463_v20, %v236_v36  ;;  %v1145_v44 = vpack.c.bf16 %v222_v33, %v215_v25  ;;  %v264_v11 = vand.u32 4294901760, %v1499_v56 }
  0x3e   :  { %v251_v10 = vsub.f32 %v1479_v34, %v250_v43 }
  0x3f   :  { %v238_v9 = vand.u32 4294901760, %v237_v4  ;;  %v265_v22 = vsub.f32 %v1499_v56, %v264_v11 }
  0x40   :  { %1053 = vmatpush3.bf16.msra.mxu1 %v1390_v41  ;;  %1125 = vmatpush3.bf16.msra.mxu0 %v1390_v41  ;;  %v252_v17 = vand.u32 4294901760, %v251_v10 }
  0x41   :  { %1054 = vmatprep.subr.bf16.mxu1 %v1274_v0  ;;  %1126 = vmatprep.subr.bf16.mxu0 %v1274_v0  ;;  %v266_v45 = vand.u32 4294901760, %v265_v22 }
  0x44   :  { %1056 = vmatpush3.bf16.msra.mxu1 %v1415_v53  ;;  %1128 = vmatpush3.bf16.msra.mxu0 %v1415_v53 }
  0x45   :  { %1057 = vmatprep.subr.bf16.mxu1 %v1274_v0  ;;  %1129 = vmatprep.subr.bf16.mxu0 %v1274_v0 }
  0x48   :  { %1059 = vmatpush3.bf16.msra.mxu1 %v1436_v63  ;;  %1131 = vmatpush3.bf16.msra.mxu0 %v1436_v63 }
  0x49   :  { %1060 = vmatprep.subr.bf16.mxu1 %v1274_v0  ;;  %1132 = vmatprep.subr.bf16.mxu0 %v1274_v0 }
  0x4b   :  { %859 = vmatmul.mubr.f32.vlgmr.msra.gmra.mrb[0].mxu1 %v150_v8  ;;  %964 = vmatmul.mubr.f32.vlgmr.msra.gmra.mrb[0].mxu0 %v148_v51  ;;  %v1139_v51 = vpack.c.bf16 %v194_v62, %v187_v61  ;;  %v230_v61 = vsub.f32 %v1458_v19, %v229_v54  ;;  %v243_v62 = vand.u32 4294901760, %v1474_v28  ;;  %v1073_v8 = vpack.c.bf16 %v224_v3, %v217_v60 }
  0x4c   :  { %1062 = vmatpush3.bf16.msra.mxu1 %v1061_v14  ;;  %1134 = vmatpush3.bf16.msra.mxu0 %v1133_v7  ;;  %v257_v7 = vand.u32 4294901760, %v1494_v42  ;;  %v1148_v14 = vpack.c.bf16 %v236_v36, %v229_v54 }
  0x4d   :  { %1063 = vmatprep.subr.bf16.mxu1 %v1274_v0  ;;  %1135 = vmatprep.subr.bf16.mxu0 %v1274_v0  ;;  %v231_v49 = vand.u32 4294901760, %v230_v61  ;;  %v244_v50 = vsub.f32 %v1474_v28, %v243_v62  ;;  %v1151_v25 = vpack.c.bf16 %v250_v43, %v243_v62 }
  0x4e   :  { %893 = vmatprep.mubr.msk.f32.mxu1 %vm1275_vm0, %v1276_v1  ;;  %998 = vmatprep.mubr.msk.f32.mxu0 %vm1275_vm0, %v1276_v1  ;;  %v1154_v33 = vpack.c.bf16 %v264_v11, %v257_v7 }
  0x4f   :  { %v245_v15 = vand.u32 4294901760, %v244_v50  ;;  %v1076_v16 = vpack.c.bf16 %v238_v9, %v231_v49 }
  0x50   :  { %1065 = vmatpush3.bf16.msra.mxu1 %v1064_v26  ;;  %1137 = vmatpush3.bf16.msra.mxu0 %v1136_v21  ;;  %v258_v21 = vsub.f32 %v1494_v42, %v257_v7 }
  0x51   :  { %1066 = vmatprep.subr.bf16.mxu1 %v1274_v0  ;;  %1138 = vmatprep.subr.bf16.mxu0 %v1274_v0  ;;  %v1079_v24 = vpack.c.bf16 %v252_v17, %v245_v15 }
  0x52   :  { %v259_v26 = vand.u32 4294901760, %v258_v21 }
  0x54   :  { %1068 = vmatpush3.bf16.msra.mxu1 %v1067_v46  ;;  %1140 = vmatpush3.bf16.msra.mxu0 %v1139_v51  ;;  %v1082_v27 = vpack.c.bf16 %v266_v45, %v259_v26  ;;  %v1085_v46 = vpack.c.bf16 %v1362_v31, %v1358_v29  ;;  %v1088_v51 = vpack.c.bf16 %v1378_v38, %v1376_v37  ;;  %v723_v31 = vld [vmem:[%s1585_s1] ss:$0 sm:$0xff] }
  0x55   :  { %1069 = vmatprep.subr.bf16.mxu1 %v1274_v0  ;;  %1141 = vmatprep.subr.bf16.mxu0 %v1274_v0  ;;  %v1091_v29 = vpack.c.bf16 %v1403_v48, %v1401_v47 }
  0x58   :  { %1071 = vmatpush3.bf16.msra.mxu1 %v1070_v2  ;;  %1143 = vmatpush3.bf16.msra.mxu0 %v1142_v59 }
  0x59   :  { %1072 = vmatprep.subr.bf16.mxu1 %v1274_v0  ;;  %1144 = vmatprep.subr.bf16.mxu0 %v1274_v0 }
  0x5c   :  { %1074 = vmatpush3.bf16.msra.mxu1 %v1073_v8  ;;  %1146 = vmatpush3.bf16.msra.mxu0 %v1145_v44 }
  0x5d   :  { %1075 = vmatprep.subr.bf16.mxu1 %v1274_v0  ;;  %1147 = vmatprep.subr.bf16.mxu0 %v1274_v0 }
  0x60   :  { %1077 = vmatpush3.bf16.msra.mxu1 %v1076_v16  ;;  %1149 = vmatpush3.bf16.msra.mxu0 %v1148_v14 }
  0x61   :  { %1078 = vmatprep.subr.bf16.mxu1 %v1274_v0  ;;  %1150 = vmatprep.subr.bf16.mxu0 %v1274_v0 }
  0x64   :  { %1080 = vmatpush3.bf16.msra.mxu1 %v1079_v24  ;;  %1152 = vmatpush3.bf16.msra.mxu0 %v1151_v25 }
  0x65   :  { %1081 = vmatprep.subr.bf16.mxu1 %v1274_v0  ;;  %1153 = vmatprep.subr.bf16.mxu0 %v1274_v0 }
  0x68   :  { %1083 = vmatpush3.bf16.msra.mxu1 %v1082_v27  ;;  %1155 = vmatpush3.bf16.msra.mxu0 %v1154_v33 }
  0x69   :  { %1084 = vmatprep.subr.bf16.mxu1 %v1274_v0  ;;  %1156 = vmatprep.subr.bf16.mxu0 %v1274_v0 }
  0x6b   :  { %894 = vmatmul.mubr.f32.vlgmr.msra.gmra.mrb[0].mxu1 %v1360_v30  ;;  %999 = vmatmul.mubr.f32.vlgmr.msra.gmra.mrb[0].mxu0 %v1360_v30 }
  0x6c   :  { %1086 = vmatpush3.bf16.msra.mxu1 %v1085_v46  ;;  %1158 = vmatpush3.bf16.msra.mxu0 %v1328_v12  ;;  %v1094_v12 = vpack.c.bf16 %v1424_v58, %v1422_v57 }
  0x6d   :  { %1087 = vmatprep.subr.bf16.mxu1 %v1274_v0  ;;  %1159 = vmatprep.subr.bf16.mxu0 %v1274_v0 }
  0x6e   :  { %928 = vmatprep.mubr.msk.f32.mxu1 %vm1275_vm0, %v1276_v1  ;;  %1033 = vmatprep.mubr.msk.f32.mxu0 %vm1275_vm0, %v1276_v1  ;;  %v1097_v1 = vpack.c.bf16 %v1445_v6, %v1442_v5 }
  0x70   :  { %1089 = vmatpush3.bf16.msra.mxu1 %v1088_v51  ;;  %1161 = vmatpush3.bf16.msra.mxu0 %v1332_v13  ;;  %v1100_v13 = vpack.c.bf16 %v1463_v20, %v1458_v19 }
  0x71   :  { %1090 = vmatprep.subr.bf16.mxu1 %v1274_v0  ;;  %1162 = vmatprep.subr.bf16.mxu0 %v1274_v0 }
  0x74   :  { %1092 = vmatpush3.bf16.msra.mxu1 %v1091_v29  ;;  %1164 = vmatpush3.bf16.msra.mxu0 %v1338_v18  ;;  %v1103_v18 = vpack.c.bf16 %v1479_v34, %v1474_v28 }
  0x75   :  { %1093 = vmatprep.subr.bf16.mxu1 %v1274_v0  ;;  %1165 = vmatprep.subr.bf16.mxu0 %v1274_v0 }
  0x78   :  { %1095 = vmatpush3.bf16.msra.mxu1 %v1094_v12  ;;  %1167 = vmatpush3.bf16.msra.mxu0 %v1348_v23  ;;  %v1106_v23 = vpack.c.bf16 %v1499_v56, %v1494_v42 }
  0x79   :  { %1096 = vmatprep.subr.bf16.mxu1 %v1274_v0  ;;  %1168 = vmatprep.subr.bf16.mxu0 %v1274_v0 }
  0x7c   :  { %1098 = vmatpush3.bf16.msra.mxu1 %v1097_v1  ;;  %1170 = vmatpush3.bf16.msra.mxu0 %v1366_v32 }
  0x7d   :  { %1099 = vmatprep.subr.bf16.mxu1 %v1274_v0  ;;  %1171 = vmatprep.subr.bf16.mxu0 %v1274_v0 }
  0x80   :  { %1101 = vmatpush3.bf16.msra.mxu1 %v1100_v13  ;;  %1173 = vmatpush3.bf16.msra.mxu0 %v1390_v41 }
  0x81   :  { %1102 = vmatprep.subr.bf16.mxu1 %v1274_v0  ;;  %1174 = vmatprep.subr.bf16.mxu0 %v1274_v0 }
  0x84   :  { %1104 = vmatpush3.bf16.msra.mxu1 %v1103_v18  ;;  %1176 = vmatpush3.bf16.msra.mxu0 %v1415_v53 }
  0x85   :  { %1105 = vmatprep.subr.bf16.mxu1 %v1274_v0  ;;  %1177 = vmatprep.subr.bf16.mxu0 %v1274_v0 }
  0x88   :  { %1107 = vmatpush3.bf16.msra.mxu1 %v1106_v23  ;;  %1179 = vmatpush3.bf16.msra.mxu0 %v1436_v63 }
  0x8b   :  { %929 = vmatmul.mubr.f32.vlgmr.msra.gmra.mrb[0].mxu1 %v1382_v40  ;;  %1034 = vmatmul.mubr.f32.vlgmr.msra.gmra.mrb[0].mxu0 %v1360_v30 }
 0x15e   :  { %v407_v32 = vpop.f32.mrb[0].mxu1  ;;  %v702_v37 = vpop.f32.mrb[0].mxu0 }
 0x15f   :  { %v1180_v38 = vadd.f32 %v723_v31, %v407_v32  ;;  %v930_v41 = vpop.f32.mrb[1].mxu1  ;;  %v1035_v47 = vpop.f32.mrb[1].mxu0 }
 0x161   :  { %v1181_v48 = vadd.f32 %v1180_v38, %v702_v37 }
 0x163   :  { %706 = vst [vmem:[#allocation7] sm:$0xff] %v1181_v48 }
 0x164   :  { %1253 = shalt.err (!%p1250_p6)
}
 0x165   :  { %s1254_s1 = scalar_lea.hbm %s1587_s3, 128 }
 0x166   :  { %p1255_p7 = scmp.ne.s32.totalorder %s1587_s3, %s1254_s1  ;;  %p1258_p8 = scmp.lt.u32.totalorder %s1254_s1, %s1587_s3 }
 0x168   :  { %p1260_p9 = pnand %p1258_p8, %p1255_p7 }
 0x16a   :  { %1263 = shalt.err (!%p1260_p9)
}
 0x16b   :  { %716 = dma.vmem_to_hbm [thread:$0]  %s714_s12, 128, %s1587_s3, [#allocation4]  }
 0x16c   :  { %1268 = dma.done.wait [#allocation4], 128  }
 0x16d   :  { %1269 = vsyncadd [#allocation4], 4294967168 }
 0x16e   :  { %720 = vsyncpa [#allocation3], 1 }
 0x16f   :  { %721 = vsyncpa [#allocation6], 1 }
 0x170   :  { %722 = vsyncpa [#allocation4], 1 }

</bundles_post_ra>
